<compile_context>
chip_gen: v5e
topology: v5e:2x2
jax: 0.10.0
libtpu: 0.0.40
codegen_flags: <defaults>
</compile_context>

<pallas_src>
import functools

import jax
import jax.numpy as jnp
from jax.experimental import pallas as pl
from jax.experimental.pallas import tpu as pltpu

D_HID = 16
N_LAYERS = 8
LANE = 128
PACK = LANE // D_HID          # 8 samples packed per 128-wide vreg row
TB_MAX = 2048                 # packed rows per grid step (2048*128*4B = 1 MiB / buffer)


def _cdiv(a, b):
    return -(-a // b)


def _round_up(n, m):
    return _cdiv(n, m) * m


def transformer_like_kernel(x_ref, wf_ref, bf_ref, wm_ref, bm_ref, wl_ref, bl_ref,
                            out_ref):
    # x_ref:  [TB, 128]          packed activations (8 samples per row), f32
    # wf_ref: [128, 128]         block-diag W1[0]                 (bf16 fast / f32 check)
    # bf_ref: [1, 128]           tiled b1[0]                      (f32)
    # wm_ref: [L-1, 128, 128]    block-diag fused W2[l] @ W1[l+1]
    # bm_ref: [L-1, 1, 128]      tiled fused biases               (f32)
    # wl_ref: [128, 128]         block-diag W2[L-1]
    # bl_ref: [1, 128]           tiled b2[L-1]                    (f32)
    mxu_dt = wf_ref.dtype  # MXU operand dtype (bf16 fast path; f32 validation path)

    # a_0 = x @ W1[0] + b1[0]
    a = jnp.dot(x_ref[...].astype(mxu_dt), wf_ref[...],
                preferred_element_type=jnp.float32) + bf_ref[...]

    # a_{l+1} = relu(a_l) @ Wf[l] + bf[l]   (fused: W2[l]@W1[l+1], b2[l]@W1[l+1]+b1[l+1])
    # N_LAYERS is small & static -> unrolled; each dot is a dense [TB,128]@[128,128].
    # TODO(synk): if bundle dumps show MXU idle gaps at the 9 serialized layer
    # boundaries (weight push), interleave two independent row halves to hide them.
    for l in range(N_LAYERS - 1):
        h = jnp.maximum(a, 0.0)                                  # ReLU kept in f32 (VPU)
        a = jnp.dot(h.astype(mxu_dt), wm_ref[l],
                    preferred_element_type=jnp.float32) + bm_ref[l]

    # out = relu(a_{L-1}) @ W2[L-1] + b2[L-1]
    h = jnp.maximum(a, 0.0)
    out = jnp.dot(h.astype(mxu_dt), wl_ref[...],
                  preferred_element_type=jnp.float32) + bl_ref[...]
    out_ref[...] = out.astype(out_ref.dtype)


def pack_params(w1, b1, w2, b2, weight_dtype=jnp.bfloat16):
    """Fuse adjacent ReLU-free linears, then expand to block-diagonal 128x128 operands.

    w1/w2 are stored transposed relative to torch (kernel computes x @ W).
    Fusion (done once, in f32, 16x16 domain):
        Wf[l] = W2[l] @ W1[l+1]        bf[l] = b2[l] @ W1[l+1] + b1[l+1]
    Forward pass becomes:
        a = x @ W1[0] + b1[0]
        a = relu(a) @ Wf[l] + bf[l]    for l = 0 .. L-2
        y = relu(a) @ W2[L-1] + b2[L-1]
    Weights are cast to `weight_dtype` (bf16 -> single-pass MXU); biases stay f32.
    """
    hp = jax.lax.Precision.HIGHEST
    w_first = w1[0]                                                          # [D, D]
    b_first = b1[0]                                                          # [D]
    w_mid = jnp.einsum("lij,ljk->lik", w2[:-1], w1[1:], precision=hp)        # [L-1, D, D]
    b_mid = jnp.einsum("lj,ljk->lk", b2[:-1], w1[1:], precision=hp) + b1[1:]  # [L-1, D]
    w_last = w2[-1]
    b_last = b2[-1]

    eye = jnp.eye(PACK, dtype=jnp.float32)

    def blockdiag(w):
        # [..., D, D] -> [..., 128, 128]: W repeated on the 8 diagonal 16x16 blocks.
        big = jnp.einsum("pq,...de->...pdqe", eye, w)
        return big.reshape(w.shape[:-2] + (LANE, LANE)).astype(weight_dtype)

    def tile_bias(b):
        # [..., D] -> [..., 1, 128]: bias repeated for each packed sample group.
        rep = (1,) * (b.ndim - 1) + (PACK,)
        return jnp.tile(b, rep).reshape(b.shape[:-1] + (1, LANE)).astype(jnp.float32)

    return (blockdiag(w_first), tile_bias(b_first),
            blockdiag(w_mid), tile_bias(b_mid),
            blockdiag(w_last), tile_bias(b_last))


@functools.partial(jax.jit, static_argnames=("tb_max",))
def transformer_like(x, wf, bf, wm, bm, wl, bl, *, tb_max=TB_MAX):
    B, D = x.shape
    assert D == D_HID

    # --- lane-pack: 8 samples per 128-wide row ------------------------------------
    rows = _cdiv(B, PACK)
    # Padding-aware tiling: bound padded-row waste to < 8 rows per grid step.
    n_steps = _cdiv(rows, tb_max)
    # v7x megacore: give the "parallel" axis >= 2 steps whenever the batch allows,
    # so both TensorCores get work.
    if n_steps < 2 and rows > 8:
        n_steps = 2
    tb = _round_up(_cdiv(rows, n_steps), 8)       # sublane-aligned block height
    rows_pad = n_steps * tb
    b_pad = rows_pad * PACK
    x_pad = jnp.pad(x, ((0, b_pad - B), (0, 0)))
    x_packed = x_pad.reshape(rows_pad, LANE)

    n_matmuls = N_LAYERS + 1                      # 1 + (L-1) fused + 1 = 9
    flops = 2 * rows_pad * LANE * LANE * n_matmuls
    bytes_accessed = (
        2 * rows_pad * LANE * x.dtype.itemsize                      # in + out
        + (wf.size + wm.size + wl.size) * wf.dtype.itemsize         # weights
        + (bf.size + bm.size + bl.size) * 4)                        # f32 biases

    out_packed = pl.pallas_call(
        transformer_like_kernel,
        out_shape=jax.ShapeDtypeStruct((rows_pad, LANE), x.dtype),
        grid_spec=pltpu.PrefetchScalarGridSpec(
            num_scalar_prefetch=0,
            grid=(n_steps,),
            in_specs=[
                pl.BlockSpec((tb, LANE), lambda i: (i, 0)),
                # Parameters: same block every step -> VMEM-resident across the grid.
                pl.BlockSpec((LANE, LANE), lambda i: (0, 0)),
                pl.BlockSpec((1, LANE), lambda i: (0, 0)),
                pl.BlockSpec((N_LAYERS - 1, LANE, LANE), lambda i: (0, 0, 0)),
                pl.BlockSpec((N_LAYERS - 1, 1, LANE), lambda i: (0, 0, 0)),
                pl.BlockSpec((LANE, LANE), lambda i: (0, 0)),
                pl.BlockSpec((1, LANE), lambda i: (0, 0)),
            ],
            out_specs=pl.BlockSpec((tb, LANE), lambda i: (i, 0)),
        ),
        compiler_params=pltpu.CompilerParams(
            dimension_semantics=("parallel",),
        ),
        cost_estimate=pl.CostEstimate(
            flops=flops, transcendentals=0, bytes_accessed=bytes_accessed),
    )(x_packed, wf, bf, wm, bm, wl, bl)

    # --- unpack & drop padding rows ------------------------------------------------
    return out_packed.reshape(b_pad, D_HID)[:B]


def init_params(key, n_layers=N_LAYERS, d_hid=D_HID):
    """Deterministic init mimicking PyTorch Linear default (uniform(-1/sqrt(in), 1/sqrt(in)))."""
    bound = 1.0 / jnp.sqrt(jnp.float32(d_hid))
    keys = jax.random.split(key, 4)
    # Stored already transposed relative to torch (so kernel does x @ W).
    w1 = jax.random.uniform(keys[0], (n_layers, d_hid, d_hid), jnp.float32, -bound, bound)
    b1 = jax.random.uniform(keys[1], (n_layers, d_hid), jnp.float32, -bound, bound)
    w2 = jax.random.uniform(keys[2], (n_layers, d_hid, d_hid), jnp.float32, -bound, bound)
    b2 = jax.random.uniform(keys[3], (n_layers, d_hid), jnp.float32, -bound, bound)
    return w1, b1, w2, b2


def reference(x, w1, b1, w2, b2):
    # Pure-JAX reference of the same (unfused) forward pass, full f32 precision.
    hp = jax.lax.Precision.HIGHEST
    for l in range(N_LAYERS):
        h = jnp.maximum(jnp.dot(x, w1[l], precision=hp) + b1[l], 0.0)
        x = jnp.dot(h, w2[l], precision=hp) + b2[l]
    return x


if __name__ == "__main__":
    key = jax.random.PRNGKey(0)
    k_params, k_x = jax.random.split(key)

    w1, b1, w2, b2 = init_params(k_params)

    batch = 36  # small; not a multiple of PACK -> also exercises the padding path
    x = jax.random.normal(k_x, (batch, D_HID), jnp.float32)
    ref = reference(x, w1, b1, w2, b2)

    # --- f32-weight validation path (tight tolerance) ---------------------------
    packed_f32 = pack_params(w1, b1, w2, b2, weight_dtype=jnp.float32)
    out_f32 = jax.block_until_ready(transformer_like(x, *packed_f32))
    assert out_f32.shape == (batch, D_HID)
    assert jnp.allclose(out_f32, ref, atol=1e-3, rtol=1e-3)

    # --- bf16-operand fast path (single-pass MXU, f32 accumulation) -------------
    packed_bf16 = pack_params(w1, b1, w2, b2, weight_dtype=jnp.bfloat16)
    out_bf16 = jax.block_until_ready(transformer_like(x, *packed_bf16))
    assert out_bf16.shape == (batch, D_HID)
    assert jnp.allclose(out_bf16, ref, atol=5e-2, rtol=5e-2)

    print("KERNEL_OK")
</pallas_src>

<mosaic_0001>
module attributes {stable_mosaic.version = 11 : i64} {
  func.func @transformer_like_kernel(%arg0: i32, %arg1: memref<8x128xf32, #tpu.memory_space<vmem>>, %arg2: memref<128x128xf32, #tpu.memory_space<vmem>>, %arg3: memref<1x128xf32, #tpu.memory_space<vmem>>, %arg4: memref<7x128x128xf32, #tpu.memory_space<vmem>>, %arg5: memref<7x1x128xf32, #tpu.memory_space<vmem>>, %arg6: memref<128x128xf32, #tpu.memory_space<vmem>>, %arg7: memref<1x128xf32, #tpu.memory_space<vmem>>, %arg8: memref<8x128xf32, #tpu.memory_space<vmem>>) attributes {dimension_semantics = [#tpu.dimension_semantics<parallel>], iteration_bounds = array<i64: 1>, scalar_prefetch = 0 : i64, scratch_operands = 0 : i64, tpu.core_type = #tpu.core_type<tc>, window_params = [{transform_indices = @transform_0, window_bounds = array<i64: 8, 128>}, {pipeline_mode = #tpu.pipeline_mode<synchronous>, transform_indices = @transform_1, window_bounds = array<i64: 128, 128>}, {pipeline_mode = #tpu.pipeline_mode<synchronous>, transform_indices = @transform_2, window_bounds = array<i64: 1, 128>}, {pipeline_mode = #tpu.pipeline_mode<synchronous>, transform_indices = @transform_3, window_bounds = array<i64: 7, 128, 128>}, {pipeline_mode = #tpu.pipeline_mode<synchronous>, transform_indices = @transform_4, window_bounds = array<i64: 7, 1, 128>}, {pipeline_mode = #tpu.pipeline_mode<synchronous>, transform_indices = @transform_5, window_bounds = array<i64: 128, 128>}, {pipeline_mode = #tpu.pipeline_mode<synchronous>, transform_indices = @transform_6, window_bounds = array<i64: 1, 128>}, {transform_indices = @transform_7, window_bounds = array<i64: 8, 128>}]} {
    %c0 = arith.constant 0 : index
    %c0_0 = arith.constant 0 : index
    %0 = vector.load %arg1[%c0, %c0_0] : memref<8x128xf32, #tpu.memory_space<vmem>>, vector<8x128xf32>
    %c0_1 = arith.constant 0 : index
    %c0_2 = arith.constant 0 : index
    %1 = vector.load %arg2[%c0_1, %c0_2] : memref<128x128xf32, #tpu.memory_space<vmem>>, vector<128x128xf32>
    %cst = arith.constant dense<0.000000e+00> : vector<8x128xf32>
    %2 = tpu.matmul %0, %1, %cst {dimension_numbers = #tpu.dot_dimension_numbers<[1], [0], [0], [1], [0, 0, 1, 1], [], []>} : vector<8x128xf32>, vector<128x128xf32>, vector<8x128xf32> -> vector<8x128xf32>
    %c0_3 = arith.constant 0 : index
    %c0_4 = arith.constant 0 : index
    %3 = vector.load %arg3[%c0_3, %c0_4] : memref<1x128xf32, #tpu.memory_space<vmem>>, vector<1x128xf32>
    %4 = vector.broadcast %3 : vector<1x128xf32> to vector<8x128xf32>
    %5 = arith.addf %2, %4 : vector<8x128xf32>
    %cst_5 = arith.constant 0.000000e+00 : f32
    %6 = vector.broadcast %cst_5 : f32 to vector<8x128xf32>
    %7 = arith.maximumf %5, %6 : vector<8x128xf32>
    %c0_6 = arith.constant 0 : index
    %c0_7 = arith.constant 0 : index
    %c0_8 = arith.constant 0 : index
    %8 = vector.load %arg4[%c0_6, %c0_7, %c0_8] : memref<7x128x128xf32, #tpu.memory_space<vmem>>, vector<1x128x128xf32>
    %9 = vector.shape_cast %8 : vector<1x128x128xf32> to vector<128x128xf32>
    %cst_9 = arith.constant dense<0.000000e+00> : vector<8x128xf32>
    %10 = tpu.matmul %7, %9, %cst_9 {dimension_numbers = #tpu.dot_dimension_numbers<[1], [0], [0], [1], [0, 0, 1, 1], [], []>} : vector<8x128xf32>, vector<128x128xf32>, vector<8x128xf32> -> vector<8x128xf32>
    %c0_10 = arith.constant 0 : index
    %c0_11 = arith.constant 0 : index
    %c0_12 = arith.constant 0 : index
    %11 = vector.load %arg5[%c0_10, %c0_11, %c0_12] : memref<7x1x128xf32, #tpu.memory_space<vmem>>, vector<1x1x128xf32>
    %12 = vector.shape_cast %11 : vector<1x1x128xf32> to vector<1x128xf32>
    %13 = vector.broadcast %12 : vector<1x128xf32> to vector<8x128xf32>
    %14 = arith.addf %10, %13 : vector<8x128xf32>
    %cst_13 = arith.constant 0.000000e+00 : f32
    %15 = vector.broadcast %cst_13 : f32 to vector<8x128xf32>
    %16 = arith.maximumf %14, %15 : vector<8x128xf32>
    %c1 = arith.constant 1 : index
    %c0_14 = arith.constant 0 : index
    %c0_15 = arith.constant 0 : index
    %17 = vector.load %arg4[%c1, %c0_14, %c0_15] : memref<7x128x128xf32, #tpu.memory_space<vmem>>, vector<1x128x128xf32>
    %18 = vector.shape_cast %17 : vector<1x128x128xf32> to vector<128x128xf32>
    %cst_16 = arith.constant dense<0.000000e+00> : vector<8x128xf32>
    %19 = tpu.matmul %16, %18, %cst_16 {dimension_numbers = #tpu.dot_dimension_numbers<[1], [0], [0], [1], [0, 0, 1, 1], [], []>} : vector<8x128xf32>, vector<128x128xf32>, vector<8x128xf32> -> vector<8x128xf32>
    %c1_17 = arith.constant 1 : index
    %c0_18 = arith.constant 0 : index
    %c0_19 = arith.constant 0 : index
    %20 = vector.load %arg5[%c1_17, %c0_18, %c0_19] : memref<7x1x128xf32, #tpu.memory_space<vmem>>, vector<1x1x128xf32>
    %21 = vector.shape_cast %20 : vector<1x1x128xf32> to vector<1x128xf32>
    %22 = vector.broadcast %21 : vector<1x128xf32> to vector<8x128xf32>
    %23 = arith.addf %19, %22 : vector<8x128xf32>
    %cst_20 = arith.constant 0.000000e+00 : f32
    %24 = vector.broadcast %cst_20 : f32 to vector<8x128xf32>
    %25 = arith.maximumf %23, %24 : vector<8x128xf32>
    %c2 = arith.constant 2 : index
    %c0_21 = arith.constant 0 : index
    %c0_22 = arith.constant 0 : index
    %26 = vector.load %arg4[%c2, %c0_21, %c0_22] : memref<7x128x128xf32, #tpu.memory_space<vmem>>, vector<1x128x128xf32>
    %27 = vector.shape_cast %26 : vector<1x128x128xf32> to vector<128x128xf32>
    %cst_23 = arith.constant dense<0.000000e+00> : vector<8x128xf32>
    %28 = tpu.matmul %25, %27, %cst_23 {dimension_numbers = #tpu.dot_dimension_numbers<[1], [0], [0], [1], [0, 0, 1, 1], [], []>} : vector<8x128xf32>, vector<128x128xf32>, vector<8x128xf32> -> vector<8x128xf32>
    %c2_24 = arith.constant 2 : index
    %c0_25 = arith.constant 0 : index
    %c0_26 = arith.constant 0 : index
    %29 = vector.load %arg5[%c2_24, %c0_25, %c0_26] : memref<7x1x128xf32, #tpu.memory_space<vmem>>, vector<1x1x128xf32>
    %30 = vector.shape_cast %29 : vector<1x1x128xf32> to vector<1x128xf32>
    %31 = vector.broadcast %30 : vector<1x128xf32> to vector<8x128xf32>
    %32 = arith.addf %28, %31 : vector<8x128xf32>
    %cst_27 = arith.constant 0.000000e+00 : f32
    %33 = vector.broadcast %cst_27 : f32 to vector<8x128xf32>
    %34 = arith.maximumf %32, %33 : vector<8x128xf32>
    %c3 = arith.constant 3 : index
    %c0_28 = arith.constant 0 : index
    %c0_29 = arith.constant 0 : index
    %35 = vector.load %arg4[%c3, %c0_28, %c0_29] : memref<7x128x128xf32, #tpu.memory_space<vmem>>, vector<1x128x128xf32>
    %36 = vector.shape_cast %35 : vector<1x128x128xf32> to vector<128x128xf32>
    %cst_30 = arith.constant dense<0.000000e+00> : vector<8x128xf32>
    %37 = tpu.matmul %34, %36, %cst_30 {dimension_numbers = #tpu.dot_dimension_numbers<[1], [0], [0], [1], [0, 0, 1, 1], [], []>} : vector<8x128xf32>, vector<128x128xf32>, vector<8x128xf32> -> vector<8x128xf32>
    %c3_31 = arith.constant 3 : index
    %c0_32 = arith.constant 0 : index
    %c0_33 = arith.constant 0 : index
    %38 = vector.load %arg5[%c3_31, %c0_32, %c0_33] : memref<7x1x128xf32, #tpu.memory_space<vmem>>, vector<1x1x128xf32>
    %39 = vector.shape_cast %38 : vector<1x1x128xf32> to vector<1x128xf32>
    %40 = vector.broadcast %39 : vector<1x128xf32> to vector<8x128xf32>
    %41 = arith.addf %37, %40 : vector<8x128xf32>
    %cst_34 = arith.constant 0.000000e+00 : f32
    %42 = vector.broadcast %cst_34 : f32 to vector<8x128xf32>
    %43 = arith.maximumf %41, %42 : vector<8x128xf32>
    %c4 = arith.constant 4 : index
    %c0_35 = arith.constant 0 : index
    %c0_36 = arith.constant 0 : index
    %44 = vector.load %arg4[%c4, %c0_35, %c0_36] : memref<7x128x128xf32, #tpu.memory_space<vmem>>, vector<1x128x128xf32>
    %45 = vector.shape_cast %44 : vector<1x128x128xf32> to vector<128x128xf32>
    %cst_37 = arith.constant dense<0.000000e+00> : vector<8x128xf32>
    %46 = tpu.matmul %43, %45, %cst_37 {dimension_numbers = #tpu.dot_dimension_numbers<[1], [0], [0], [1], [0, 0, 1, 1], [], []>} : vector<8x128xf32>, vector<128x128xf32>, vector<8x128xf32> -> vector<8x128xf32>
    %c4_38 = arith.constant 4 : index
    %c0_39 = arith.constant 0 : index
    %c0_40 = arith.constant 0 : index
    %47 = vector.load %arg5[%c4_38, %c0_39, %c0_40] : memref<7x1x128xf32, #tpu.memory_space<vmem>>, vector<1x1x128xf32>
    %48 = vector.shape_cast %47 : vector<1x1x128xf32> to vector<1x128xf32>
    %49 = vector.broadcast %48 : vector<1x128xf32> to vector<8x128xf32>
    %50 = arith.addf %46, %49 : vector<8x128xf32>
    %cst_41 = arith.constant 0.000000e+00 : f32
    %51 = vector.broadcast %cst_41 : f32 to vector<8x128xf32>
    %52 = arith.maximumf %50, %51 : vector<8x128xf32>
    %c5 = arith.constant 5 : index
    %c0_42 = arith.constant 0 : index
    %c0_43 = arith.constant 0 : index
    %53 = vector.load %arg4[%c5, %c0_42, %c0_43] : memref<7x128x128xf32, #tpu.memory_space<vmem>>, vector<1x128x128xf32>
    %54 = vector.shape_cast %53 : vector<1x128x128xf32> to vector<128x128xf32>
    %cst_44 = arith.constant dense<0.000000e+00> : vector<8x128xf32>
    %55 = tpu.matmul %52, %54, %cst_44 {dimension_numbers = #tpu.dot_dimension_numbers<[1], [0], [0], [1], [0, 0, 1, 1], [], []>} : vector<8x128xf32>, vector<128x128xf32>, vector<8x128xf32> -> vector<8x128xf32>
    %c5_45 = arith.constant 5 : index
    %c0_46 = arith.constant 0 : index
    %c0_47 = arith.constant 0 : index
    %56 = vector.load %arg5[%c5_45, %c0_46, %c0_47] : memref<7x1x128xf32, #tpu.memory_space<vmem>>, vector<1x1x128xf32>
    %57 = vector.shape_cast %56 : vector<1x1x128xf32> to vector<1x128xf32>
    %58 = vector.broadcast %57 : vector<1x128xf32> to vector<8x128xf32>
    %59 = arith.addf %55, %58 : vector<8x128xf32>
    %cst_48 = arith.constant 0.000000e+00 : f32
    %60 = vector.broadcast %cst_48 : f32 to vector<8x128xf32>
    %61 = arith.maximumf %59, %60 : vector<8x128xf32>
    %c6 = arith.constant 6 : index
    %c0_49 = arith.constant 0 : index
    %c0_50 = arith.constant 0 : index
    %62 = vector.load %arg4[%c6, %c0_49, %c0_50] : memref<7x128x128xf32, #tpu.memory_space<vmem>>, vector<1x128x128xf32>
    %63 = vector.shape_cast %62 : vector<1x128x128xf32> to vector<128x128xf32>
    %cst_51 = arith.constant dense<0.000000e+00> : vector<8x128xf32>
    %64 = tpu.matmul %61, %63, %cst_51 {dimension_numbers = #tpu.dot_dimension_numbers<[1], [0], [0], [1], [0, 0, 1, 1], [], []>} : vector<8x128xf32>, vector<128x128xf32>, vector<8x128xf32> -> vector<8x128xf32>
    %c6_52 = arith.constant 6 : index
    %c0_53 = arith.constant 0 : index
    %c0_54 = arith.constant 0 : index
    %65 = vector.load %arg5[%c6_52, %c0_53, %c0_54] : memref<7x1x128xf32, #tpu.memory_space<vmem>>, vector<1x1x128xf32>
    %66 = vector.shape_cast %65 : vector<1x1x128xf32> to vector<1x128xf32>
    %67 = vector.broadcast %66 : vector<1x128xf32> to vector<8x128xf32>
    %68 = arith.addf %64, %67 : vector<8x128xf32>
    %cst_55 = arith.constant 0.000000e+00 : f32
    %69 = vector.broadcast %cst_55 : f32 to vector<8x128xf32>
    %70 = arith.maximumf %68, %69 : vector<8x128xf32>
    %c0_56 = arith.constant 0 : index
    %c0_57 = arith.constant 0 : index
    %71 = vector.load %arg6[%c0_56, %c0_57] : memref<128x128xf32, #tpu.memory_space<vmem>>, vector<128x128xf32>
    %cst_58 = arith.constant dense<0.000000e+00> : vector<8x128xf32>
    %72 = tpu.matmul %70, %71, %cst_58 {dimension_numbers = #tpu.dot_dimension_numbers<[1], [0], [0], [1], [0, 0, 1, 1], [], []>} : vector<8x128xf32>, vector<128x128xf32>, vector<8x128xf32> -> vector<8x128xf32>
    %c0_59 = arith.constant 0 : index
    %c0_60 = arith.constant 0 : index
    %73 = vector.load %arg7[%c0_59, %c0_60] : memref<1x128xf32, #tpu.memory_space<vmem>>, vector<1x128xf32>
    %74 = vector.broadcast %73 : vector<1x128xf32> to vector<8x128xf32>
    %75 = arith.addf %72, %74 : vector<8x128xf32>
    %c0_61 = arith.constant 0 : index
    %c0_62 = arith.constant 0 : index
    %76 = vector.load %arg8[%c0_61, %c0_62] : memref<8x128xf32, #tpu.memory_space<vmem>>, vector<8x128xf32>
    tpu.vector_store %arg8[%c0_61, %c0_62], %75 {strides = array<i32>} : memref<8x128xf32, #tpu.memory_space<vmem>>, vector<8x128xf32>,
    return
  }
  func.func @transform_0(%arg0: i32) -> (i32, i32) {
    %c0_i32 = arith.constant 0 : i32
    %c0_i32_0 = arith.constant 0 : i32
    return %arg0, %c0_i32 : i32, i32
  }
  func.func @transform_1(%arg0: i32) -> (i32, i32) {
    %c0_i32 = arith.constant 0 : i32
    %c0_i32_0 = arith.constant 0 : i32
    %c0_i32_1 = arith.constant 0 : i32
    return %c0_i32, %c0_i32_0 : i32, i32
  }
  func.func @transform_2(%arg0: i32) -> (i32, i32) {
    %c0_i32 = arith.constant 0 : i32
    %c0_i32_0 = arith.constant 0 : i32
    %c0_i32_1 = arith.constant 0 : i32
    return %c0_i32, %c0_i32_0 : i32, i32
  }
  func.func @transform_3(%arg0: i32) -> (i32, i32, i32) {
    %c0_i32 = arith.constant 0 : i32
    %c0_i32_0 = arith.constant 0 : i32
    %c0_i32_1 = arith.constant 0 : i32
    %c0_i32_2 = arith.constant 0 : i32
    return %c0_i32, %c0_i32_0, %c0_i32_1 : i32, i32, i32
  }
  func.func @transform_4(%arg0: i32) -> (i32, i32, i32) {
    %c0_i32 = arith.constant 0 : i32
    %c0_i32_0 = arith.constant 0 : i32
    %c0_i32_1 = arith.constant 0 : i32
    %c0_i32_2 = arith.constant 0 : i32
    return %c0_i32, %c0_i32_0, %c0_i32_1 : i32, i32, i32
  }
  func.func @transform_5(%arg0: i32) -> (i32, i32) {
    %c0_i32 = arith.constant 0 : i32
    %c0_i32_0 = arith.constant 0 : i32
    %c0_i32_1 = arith.constant 0 : i32
    return %c0_i32, %c0_i32_0 : i32, i32
  }
  func.func @transform_6(%arg0: i32) -> (i32, i32) {
    %c0_i32 = arith.constant 0 : i32
    %c0_i32_0 = arith.constant 0 : i32
    %c0_i32_1 = arith.constant 0 : i32
    return %c0_i32, %c0_i32_0 : i32, i32
  }
  func.func @transform_7(%arg0: i32) -> (i32, i32) {
    %c0_i32 = arith.constant 0 : i32
    %c0_i32_0 = arith.constant 0 : i32
    return %arg0, %c0_i32 : i32, i32
  }
}

</mosaic_0001>

<bundles_post_ra>
// kernel: transformer_like.1
= control target key start
LH: loop header
LB: loop body
LE: loop exit
PB: predicated region body
PF: predicated region fallthrough
CT: control target
= control target key end

     0   :  { %12 = vsyncpa [#allocation3], 0  ;;  %s648_s0 = inlined_call_operand.vmem [shape: f32[8,128], index: 0, kind: input, shape index: {}]   ;;  %s649_s1 = inlined_call_operand.vmem [shape: f32[128,128], index: 1, kind: input, shape index: {}]   ;;  %s650_s2 = inlined_call_operand.vmem [shape: f32[1,128], index: 2, kind: input, shape index: {}]   ;;  %s651_s3 = inlined_call_operand.hbm [shape: f32[7,128,128], index: 3, kind: input, shape index: {}]   ;;  %s652_s4 = inlined_call_operand.vmem [shape: f32[7,1,128], index: 4, kind: input, shape index: {}]   ;;  %s653_s5 = inlined_call_operand.hbm [shape: f32[128,128], index: 5, kind: input, shape index: {}]   ;;  %s654_s6 = inlined_call_operand.vmem [shape: f32[1,128], index: 6, kind: input, shape index: {}]   ;;  %s655_s7 = inlined_call_operand.vmem [shape: f32[8,128], index: 7, kind: output, shape index: {}]  }
   0x1   :  { %s24_s26 = sshll.u32 %s651_s3, 4  ;;  %s25_s26 = int_to_ptr.hbm [resolvable:$true] %s24_s26 }
   0x2   :  { %13 = vsyncpa [#allocation5], 0  ;;  %s517_s27 = smov [#allocation2]   ;;  %s39_s8 = sshll.u32 %s653_s5, 4  ;;  %s40_s8 = int_to_ptr.hbm [resolvable:$true] %s39_s8 }
   0x3   :  { %s26_s28 = sshll.u32 %s517_s27, 4  ;;  %s518_s9 = smov 128   ;;  %s27_s28 = int_to_ptr.vmem [resolvable:$true] %s26_s28 }
   0x4   :  { %s519_s10 = smov 8   ;;  %s520_s11 = smov [#allocation4]  }
   0x5   :  { %32 = dma.hbm_to_vmem [thread:$0]  %s25_s26, 14336, %s27_s28, [#allocation3], %s518_s9, %s518_s9, %s519_s10  }
   0x6   :  { %s41_s12 = sshll.u32 %s520_s11, 4  ;;  %s42_s12 = int_to_ptr.vmem [resolvable:$true] %s41_s12 }
   0x7   :  { %47 = dma.hbm_to_vmem [thread:$0]  %s40_s8, 2048, %s42_s12, [#allocation5], %s518_s9, %s518_s9, %s519_s10  }
   0x8   :  { %513 = dma.done.wait [#allocation3], 14336  }
   0x9   :  { %514 = vsyncadd [#allocation3], 4294952960 }
   0xa   :  { %515 = dma.done.wait [#allocation5], 2048  }
   0xb   :  { %516 = vsyncadd [#allocation5], 4294965248  ;;  %v74_v0 = vld [vmem:[%s649_s1 + $0x78] sm:$0xff]  ;;  %v73_v1 = vld [vmem:[%s649_s1 + $0x70] sm:$0xff] }
   0xc   :  { %79 = vmatpush.msra.mxu0 %v74_v0  ;;  %v72_v2 = vld [vmem:[%s649_s1 + $0x68] sm:$0xff]  ;;  %v71_v3 = vld [vmem:[%s649_s1 + $0x60] sm:$0xff]  ;;  %v115_v4 = vld [vmem:[#allocation2 + $0x78] sm:$0xff] }
   0xd   :  { %v70_v5 = vld [vmem:[%s649_s1 + $0x58] sm:$0xff]  ;;  %120 = vmatpush.msra.mxu1 %v115_v4  ;;  %v114_v6 = vld [vmem:[#allocation2 + $0x70] sm:$0xff]  ;;  %v113_v7 = vld [vmem:[#allocation2 + $0x68] sm:$0xff] }
   0xe   :  { %80 = vmatpush.msra.mxu0 %v73_v1  ;;  %v69_v8 = vld [vmem:[%s649_s1 + $0x50] sm:$0xff]  ;;  %v68_v9 = vld [vmem:[%s649_s1 + $0x48] sm:$0xff]  ;;  %v112_v10 = vld [vmem:[#allocation2 + $0x60] sm:$0xff] }
   0xf   :  { %121 = vmatpush.msra.mxu1 %v114_v6  ;;  %v67_v11 = vld [vmem:[%s649_s1 + $0x40] sm:$0xff]  ;;  %v111_v12 = vld [vmem:[#allocation2 + $0x58] sm:$0xff]  ;;  %v110_v13 = vld [vmem:[#allocation2 + $0x50] sm:$0xff] }
  0x10   :  { %81 = vmatpush.msra.mxu0 %v72_v2  ;;  %v66_v14 = vld [vmem:[%s649_s1 + $0x38] sm:$0xff]  ;;  %v109_v15 = vld [vmem:[#allocation2 + $0x48] sm:$0xff]  ;;  %v65_v16 = vld [vmem:[%s649_s1 + $0x30] sm:$0xff] }
  0x11   :  { %122 = vmatpush.msra.mxu1 %v113_v7  ;;  %v108_v17 = vld [vmem:[#allocation2 + $0x40] sm:$0xff]  ;;  %v64_v18 = vld [vmem:[%s649_s1 + $0x28] sm:$0xff]  ;;  %v107_v19 = vld [vmem:[#allocation2 + $0x38] sm:$0xff] }
  0x12   :  { %82 = vmatpush.msra.mxu0 %v71_v3  ;;  %v63_v20 = vld [vmem:[%s649_s1 + $0x20] sm:$0xff]  ;;  %v106_v21 = vld [vmem:[#allocation2 + $0x30] sm:$0xff]  ;;  %v62_v22 = vld [vmem:[%s649_s1 + $0x18] sm:$0xff] }
  0x13   :  { %123 = vmatpush.msra.mxu1 %v112_v10  ;;  %v105_v23 = vld [vmem:[#allocation2 + $0x28] sm:$0xff]  ;;  %v61_v24 = vld [vmem:[%s649_s1 + $0x10] sm:$0xff]  ;;  %v104_v25 = vld [vmem:[#allocation2 + $0x20] sm:$0xff] }
  0x14   :  { %83 = vmatpush.msra.mxu0 %v70_v5  ;;  %v60_v26 = vld [vmem:[%s649_s1 + $0x8] sm:$0xff]  ;;  %v103_v27 = vld [vmem:[#allocation2 + $0x18] sm:$0xff]  ;;  %v59_v28 = vld [vmem:[%s649_s1] sm:$0xff] }
  0x15   :  { %124 = vmatpush.msra.mxu1 %v111_v12  ;;  %v58_v29 = vld [vmem:[%s648_s0] sm:$0xff]  ;;  %v102_v30 = vld [vmem:[#allocation2 + $0x10] sm:$0xff]  ;;  %v101_v31 = vld [vmem:[#allocation2 + $0x8] sm:$0xff] }
  0x16   :  { %84 = vmatpush.msra.mxu0 %v69_v8  ;;  %v100_v32 = vld [vmem:[#allocation2] sm:$0xff]  ;;  %v157_v33 = vld [vmem:[#allocation2 + $0xf8] sm:$0xff]  ;;  %v156_v34 = vld [vmem:[#allocation2 + $0xf0] sm:$0xff] }
  0x17   :  { %125 = vmatpush.msra.mxu1 %v110_v13  ;;  %163 = vmatpush.msra.mxu2 %v157_v33  ;;  %v155_v35 = vld [vmem:[#allocation2 + $0xe8] sm:$0xff]  ;;  %v154_v36 = vld [vmem:[#allocation2 + $0xe0] sm:$0xff]  ;;  %v153_v37 = vld [vmem:[#allocation2 + $0xd8] sm:$0xff] }
  0x18   :  { %85 = vmatpush.msra.mxu0 %v68_v9  ;;  %v152_v38 = vld [vmem:[#allocation2 + $0xd0] sm:$0xff]  ;;  %v151_v39 = vld [vmem:[#allocation2 + $0xc8] sm:$0xff]  ;;  %v150_v40 = vld [vmem:[#allocation2 + $0xc0] sm:$0xff] }
  0x19   :  { %126 = vmatpush.msra.mxu1 %v109_v15  ;;  %164 = vmatpush.msra.mxu2 %v156_v34  ;;  %v149_v41 = vld [vmem:[#allocation2 + $0xb8] sm:$0xff]  ;;  %v148_v42 = vld [vmem:[#allocation2 + $0xb0] sm:$0xff]  ;;  %v147_v43 = vld [vmem:[#allocation2 + $0xa8] sm:$0xff] }
  0x1a   :  { %86 = vmatpush.msra.mxu0 %v67_v11  ;;  %v146_v44 = vld [vmem:[#allocation2 + $0xa0] sm:$0xff]  ;;  %v145_v45 = vld [vmem:[#allocation2 + $0x98] sm:$0xff]  ;;  %v144_v50 = vld [vmem:[#allocation2 + $0x90] sm:$0xff] }
  0x1b   :  { %127 = vmatpush.msra.mxu1 %v108_v17  ;;  %165 = vmatpush.msra.mxu2 %v155_v35  ;;  %v456_v46 = vld [vmem:[%s650_s2] ss:$0 sm:$0xff]  ;;  %v143_v51 = vld [vmem:[#allocation2 + $0x88] sm:$0xff]  ;;  %v200_v53 = vld [vmem:[#allocation2 + $0x178] sm:$0xff] }
  0x1c   :  { %87 = vmatpush.msra.mxu0 %v66_v14  ;;  %v142_v52 = vld [vmem:[#allocation2 + $0x80] sm:$0xff]  ;;  %v199_v54 = vld [vmem:[#allocation2 + $0x170] sm:$0xff]  ;;  %206 = vmatpush.msra.mxu3 %v200_v53  ;;  %v198_v55 = vld [vmem:[#allocation2 + $0x168] sm:$0xff] }
  0x1d   :  { %128 = vmatpush.msra.mxu1 %v107_v19  ;;  %166 = vmatpush.msra.mxu2 %v154_v36  ;;  %v197_v56 = vld [vmem:[#allocation2 + $0x160] sm:$0xff]  ;;  %v196_v57 = vld [vmem:[#allocation2 + $0x158] sm:$0xff]  ;;  %v195_v58 = vld [vmem:[#allocation2 + $0x150] sm:$0xff] }
  0x1e   :  { %88 = vmatpush.msra.mxu0 %v65_v16  ;;  %207 = vmatpush.msra.mxu3 %v199_v54  ;;  %v194_v59 = vld [vmem:[#allocation2 + $0x148] sm:$0xff]  ;;  %v193_v60 = vld [vmem:[#allocation2 + $0x140] sm:$0xff]  ;;  %v192_v61 = vld [vmem:[#allocation2 + $0x138] sm:$0xff] }
  0x1f   :  { %129 = vmatpush.msra.mxu1 %v106_v21  ;;  %167 = vmatpush.msra.mxu2 %v153_v37  ;;  %v191_v62 = vld [vmem:[#allocation2 + $0x130] sm:$0xff]  ;;  %v190_v63 = vld [vmem:[#allocation2 + $0x128] sm:$0xff]  ;;  %v189_v0 = vld [vmem:[#allocation2 + $0x120] sm:$0xff] }
  0x20   :  { %89 = vmatpush.msra.mxu0 %v64_v18  ;;  %208 = vmatpush.msra.mxu3 %v198_v55  ;;  %v188_v1 = vld [vmem:[#allocation2 + $0x118] sm:$0xff]  ;;  %v457_v2 = vld [vmem:[%s652_s4] ss:$0 sm:$0xff]  ;;  %v187_v6 = vld [vmem:[#allocation2 + $0x110] sm:$0xff] }
  0x21   :  { %130 = vmatpush.msra.mxu1 %v105_v23  ;;  %168 = vmatpush.msra.mxu2 %v152_v38  ;;  %v186_v7 = vld [vmem:[#allocation2 + $0x108] sm:$0xff]  ;;  %v185_v8 = vld [vmem:[#allocation2 + $0x100] sm:$0xff]  ;;  %v243_v9 = vld [vmem:[#allocation2 + $0x1f8] sm:$0xff] }
  0x22   :  { %90 = vmatpush.msra.mxu0 %v63_v20  ;;  %209 = vmatpush.msra.mxu3 %v197_v56  ;;  %v242_v10 = vld [vmem:[#allocation2 + $0x1f0] sm:$0xff]  ;;  %v241_v11 = vld [vmem:[#allocation2 + $0x1e8] sm:$0xff]  ;;  %v240_v12 = vld [vmem:[#allocation2 + $0x1e0] sm:$0xff] }
  0x23   :  { %131 = vmatpush.msra.mxu1 %v104_v25  ;;  %169 = vmatpush.msra.mxu2 %v151_v39  ;;  %v239_v13 = vld [vmem:[#allocation2 + $0x1d8] sm:$0xff]  ;;  %v238_v14 = vld [vmem:[#allocation2 + $0x1d0] sm:$0xff]  ;;  %v237_v15 = vld [vmem:[#allocation2 + $0x1c8] sm:$0xff] }
  0x24   :  { %91 = vmatpush.msra.mxu0 %v62_v22  ;;  %210 = vmatpush.msra.mxu3 %v196_v57  ;;  %v236_v16 = vld [vmem:[#allocation2 + $0x1c0] sm:$0xff]  ;;  %v235_v17 = vld [vmem:[#allocation2 + $0x1b8] sm:$0xff]  ;;  %v234_v18 = vld [vmem:[#allocation2 + $0x1b0] sm:$0xff] }
  0x25   :  { %132 = vmatpush.msra.mxu1 %v103_v27  ;;  %170 = vmatpush.msra.mxu2 %v150_v40  ;;  %v233_v19 = vld [vmem:[#allocation2 + $0x1a8] sm:$0xff]  ;;  %v232_v20 = vld [vmem:[#allocation2 + $0x1a0] sm:$0xff]  ;;  %v231_v21 = vld [vmem:[#allocation2 + $0x198] sm:$0xff] }
  0x26   :  { %92 = vmatpush.msra.mxu0 %v61_v24  ;;  %211 = vmatpush.msra.mxu3 %v195_v58  ;;  %v458_v22 = vld [vmem:[%s652_s4 + $0x1] ss:$0 sm:$0xff]  ;;  %v229_v27 = vld [vmem:[#allocation2 + $0x188] sm:$0xff]  ;;  %v282_v33 = vld [vmem:[#allocation2 + $0x258] sm:$0xff] }
  0x27   :  { %133 = vmatpush.msra.mxu1 %v102_v30  ;;  %171 = vmatpush.msra.mxu2 %v149_v41  ;;  %v285_v30 = vld [vmem:[#allocation2 + $0x270] sm:$0xff]  ;;  %v280_v35 = vld [vmem:[#allocation2 + $0x248] sm:$0xff]  ;;  %v279_v36 = vld [vmem:[#allocation2 + $0x240] sm:$0xff] }
  0x28   :  { %93 = vmatpush.msra.mxu0 %v60_v26  ;;  %212 = vmatpush.msra.mxu3 %v194_v59  ;;  %v230_v26 = vld [vmem:[#allocation2 + $0x190] sm:$0xff]  ;;  %v278_v37 = vld [vmem:[#allocation2 + $0x238] sm:$0xff]  ;;  %v276_v39 = vld [vmem:[#allocation2 + $0x228] sm:$0xff] }
  0x29   :  { %134 = vmatpush.msra.mxu1 %v101_v31  ;;  %172 = vmatpush.msra.mxu2 %v148_v42  ;;  %v284_v31 = vld [vmem:[#allocation2 + $0x268] sm:$0xff]  ;;  %v281_v34 = vld [vmem:[#allocation2 + $0x250] sm:$0xff]  ;;  %v275_v40 = vld [vmem:[#allocation2 + $0x220] sm:$0xff] }
  0x2a   :  { %94 = vmatpush.msra.mxu0 %v59_v28  ;;  %213 = vmatpush.msra.mxu3 %v193_v60  ;;  %v228_v28 = vld [vmem:[#allocation2 + $0x180] sm:$0xff]  ;;  %v277_v38 = vld [vmem:[#allocation2 + $0x230] sm:$0xff]  ;;  %v274_v41 = vld [vmem:[#allocation2 + $0x218] sm:$0xff] }
  0x2b   :  { %95 = vmatmul.f32.vlgmr.msra.gmra.mxu0 %v58_v29  ;;  %135 = vmatpush.msra.mxu1 %v100_v32  ;;  %v286_v29 = vld [vmem:[#allocation2 + $0x278] sm:$0xff]  ;;  %v283_v32 = vld [vmem:[#allocation2 + $0x260] sm:$0xff]  ;;  %v324_v54 = vld [vmem:[#allocation2 + $0x2d0] sm:$0xff] }
  0x2c   :  { %173 = vmatpush.msra.mxu2 %v147_v43  ;;  %214 = vmatpush.msra.mxu3 %v192_v61  ;;  %v459_v42 = vld [vmem:[%s652_s4 + $0x2] ss:$0 sm:$0xff]  ;;  %v325_v53 = vld [vmem:[#allocation2 + $0x2d8] sm:$0xff]  ;;  %v323_v55 = vld [vmem:[#allocation2 + $0x2c8] sm:$0xff] }
  0x2d   :  { %249 = vmatpush.msrb.mxu0 %v243_v9  ;;  %292 = vmatpush.msrb.mxu1 %v286_v29  ;;  %v322_v56 = vld [vmem:[#allocation2 + $0x2c0] sm:$0xff]  ;;  %v321_v57 = vld [vmem:[#allocation2 + $0x2b8] sm:$0xff]  ;;  %v320_v58 = vld [vmem:[#allocation2 + $0x2b0] sm:$0xff] }
  0x2e   :  { %174 = vmatpush.msra.mxu2 %v146_v44  ;;  %215 = vmatpush.msra.mxu3 %v191_v62  ;;  %v319_v59 = vld [vmem:[#allocation2 + $0x2a8] sm:$0xff]  ;;  %v318_v60 = vld [vmem:[#allocation2 + $0x2a0] sm:$0xff]  ;;  %v317_v61 = vld [vmem:[#allocation2 + $0x298] sm:$0xff] }
  0x2f   :  { %250 = vmatpush.msrb.mxu0 %v242_v10  ;;  %293 = vmatpush.msrb.mxu1 %v285_v30  ;;  %v460_v62 = vld [vmem:[%s652_s4 + $0x3] ss:$0 sm:$0xff]  ;;  %v368_v9 = vld [vmem:[#allocation2 + $0x358] sm:$0xff]  ;;  %v367_v10 = vld [vmem:[#allocation2 + $0x350] sm:$0xff] }
  0x30   :  { %175 = vmatpush.msra.mxu2 %v145_v45  ;;  %216 = vmatpush.msra.mxu3 %v190_v63  ;;  %v410_v29 = vld [vmem:[#allocation4 + $0x58] sm:$0xff]  ;;  %v409_v30 = vld [vmem:[#allocation4 + $0x50] sm:$0xff] }
  0x31   :  { %251 = vmatpush.msrb.mxu0 %v241_v11  ;;  %294 = vmatpush.msrb.mxu1 %v284_v31  ;;  %v366_v11 = vld [vmem:[#allocation2 + $0x348] sm:$0xff] }
  0x32   :  { %176 = vmatpush.msra.mxu2 %v144_v50  ;;  %217 = vmatpush.msra.mxu3 %v189_v0  ;;  %v328_v50 = vld [vmem:[#allocation2 + $0x2f0] sm:$0xff]  ;;  %v408_v31 = vld [vmem:[#allocation4 + $0x48] sm:$0xff] }
  0x33   :  { %252 = vmatpush.msrb.mxu0 %v240_v12  ;;  %295 = vmatpush.msrb.mxu1 %v283_v32  ;;  %v365_v12 = vld [vmem:[#allocation2 + $0x340] sm:$0xff] }
  0x34   :  { %177 = vmatpush.msra.mxu2 %v143_v51  ;;  %218 = vmatpush.msra.mxu3 %v188_v1  ;;  %v327_v51 = vld [vmem:[#allocation2 + $0x2e8] sm:$0xff]  ;;  %v407_v32 = vld [vmem:[#allocation4 + $0x40] sm:$0xff] }
  0x35   :  { %253 = vmatpush.msrb.mxu0 %v239_v13  ;;  %296 = vmatpush.msrb.mxu1 %v282_v33  ;;  %v364_v13 = vld [vmem:[#allocation2 + $0x338] sm:$0xff] }
  0x36   :  { %178 = vmatpush.msra.mxu2 %v142_v52  ;;  %219 = vmatpush.msra.mxu3 %v187_v6  ;;  %v326_v52 = vld [vmem:[#allocation2 + $0x2e0] sm:$0xff]  ;;  %v371_v6 = vld [vmem:[#allocation2 + $0x370] sm:$0xff]  ;;  %v406_v33 = vld [vmem:[#allocation4 + $0x38] sm:$0xff] }
  0x37   :  { %254 = vmatpush.msrb.mxu0 %v238_v14  ;;  %297 = vmatpush.msrb.mxu1 %v281_v34  ;;  %v363_v14 = vld [vmem:[#allocation2 + $0x330] sm:$0xff] }
  0x38   :  { %220 = vmatpush.msra.mxu3 %v186_v7  ;;  %v370_v7 = vld [vmem:[#allocation2 + $0x368] sm:$0xff]  ;;  %v405_v34 = vld [vmem:[#allocation4 + $0x30] sm:$0xff] }
  0x39   :  { %255 = vmatpush.msrb.mxu0 %v237_v15  ;;  %298 = vmatpush.msrb.mxu1 %v280_v35  ;;  %v362_v15 = vld [vmem:[#allocation2 + $0x328] sm:$0xff] }
  0x3a   :  { %221 = vmatpush.msra.mxu3 %v185_v8  ;;  %v369_v8 = vld [vmem:[#allocation2 + $0x360] sm:$0xff]  ;;  %v404_v35 = vld [vmem:[#allocation4 + $0x28] sm:$0xff] }
  0x3b   :  { %256 = vmatpush.msrb.mxu0 %v236_v16  ;;  %299 = vmatpush.msrb.mxu1 %v279_v36  ;;  %v361_v16 = vld [vmem:[#allocation2 + $0x320] sm:$0xff] }
  0x3c   :  { %v403_v36 = vld [vmem:[#allocation4 + $0x20] sm:$0xff] }
  0x3d   :  { %257 = vmatpush.msrb.mxu0 %v235_v17  ;;  %300 = vmatpush.msrb.mxu1 %v278_v37  ;;  %v360_v17 = vld [vmem:[#allocation2 + $0x318] sm:$0xff] }
  0x3e   :  { %v402_v37 = vld [vmem:[#allocation4 + $0x18] sm:$0xff] }
  0x3f   :  { %258 = vmatpush.msrb.mxu0 %v234_v18  ;;  %301 = vmatpush.msrb.mxu1 %v277_v38  ;;  %v461_v18 = vld [vmem:[%s652_s4 + $0x4] ss:$0 sm:$0xff]  ;;  %v462_v38 = vld [vmem:[%s652_s4 + $0x5] ss:$0 sm:$0xff] }
  0x41   :  { %259 = vmatpush.msrb.mxu0 %v233_v19  ;;  %302 = vmatpush.msrb.mxu1 %v276_v39 }
  0x43   :  { %260 = vmatpush.msrb.mxu0 %v232_v20  ;;  %303 = vmatpush.msrb.mxu1 %v275_v40 }
  0x45   :  { %261 = vmatpush.msrb.mxu0 %v231_v21  ;;  %304 = vmatpush.msrb.mxu1 %v274_v41 }
  0x47   :  { %262 = vmatpush.msrb.mxu0 %v230_v26  ;;  %v413_v26 = vld [vmem:[#allocation4 + $0x70] sm:$0xff] }
  0x49   :  { %263 = vmatpush.msrb.mxu0 %v229_v27  ;;  %v412_v27 = vld [vmem:[#allocation4 + $0x68] sm:$0xff] }
  0x4b   :  { %264 = vmatpush.msrb.mxu0 %v228_v28  ;;  %v411_v28 = vld [vmem:[#allocation4 + $0x60] sm:$0xff] }
  0xa8   :  { %v96_v47 = vpop.f32.mrf.mxu0 }
  0xa9   :  { %v97_v48 = vadd.f32 %v456_v46, %v96_v47  ;;  %v273_v46 = vld [vmem:[#allocation2 + $0x210] sm:$0xff]  ;;  %v272_v47 = vld [vmem:[#allocation2 + $0x208] sm:$0xff] }
  0xaa   :  { %305 = vmatpush.msrb.mxu1 %v273_v46 }
  0xab   :  { %v99_v49 = vmax.f32 %v97_v48, 0.0  ;;  %v271_v48 = vld [vmem:[#allocation2 + $0x200] sm:$0xff] }
  0xac   :  { %306 = vmatpush.msrb.mxu1 %v272_v47 }
  0xad   :  { %136 = vmatmul.f32.vlgmr.msra.gmra.mxu1 %v99_v49  ;;  %v329_v49 = vld [vmem:[#allocation2 + $0x2f8] sm:$0xff] }
  0xae   :  { %307 = vmatpush.msrb.mxu1 %v271_v48  ;;  %335 = vmatpush.msrb.mxu2 %v329_v49  ;;  %v464_v49 = vld [vmem:[%s654_s6] ss:$0 sm:$0xff] }
  0xb0   :  { %336 = vmatpush.msrb.mxu2 %v328_v50 }
  0xb2   :  { %337 = vmatpush.msrb.mxu2 %v327_v51 }
  0xb4   :  { %338 = vmatpush.msrb.mxu2 %v326_v52 }
  0xb6   :  { %339 = vmatpush.msrb.mxu2 %v325_v53 }
  0xb8   :  { %340 = vmatpush.msrb.mxu2 %v324_v54 }
  0xba   :  { %341 = vmatpush.msrb.mxu2 %v323_v55 }
  0xbc   :  { %342 = vmatpush.msrb.mxu2 %v322_v56 }
  0xbe   :  { %343 = vmatpush.msrb.mxu2 %v321_v57 }
  0xc0   :  { %344 = vmatpush.msrb.mxu2 %v320_v58 }
  0xc2   :  { %345 = vmatpush.msrb.mxu2 %v319_v59 }
  0xc4   :  { %346 = vmatpush.msrb.mxu2 %v318_v60 }
  0xc6   :  { %347 = vmatpush.msrb.mxu2 %v317_v61 }
 0x12a   :  { %v137_v3 = vpop.f32.mrf.mxu1 }
 0x12b   :  { %v138_v4 = vadd.f32 %v457_v2, %v137_v3  ;;  %v316_v2 = vld [vmem:[#allocation2 + $0x290] sm:$0xff]  ;;  %v315_v3 = vld [vmem:[#allocation2 + $0x288] sm:$0xff] }
 0x12c   :  { %348 = vmatpush.msrb.mxu2 %v316_v2 }
 0x12d   :  { %v140_v5 = vmax.f32 %v138_v4, 0.0  ;;  %v314_v4 = vld [vmem:[#allocation2 + $0x280] sm:$0xff] }
 0x12e   :  { %349 = vmatpush.msrb.mxu2 %v315_v3 }
 0x12f   :  { %179 = vmatmul.f32.vlgmr.msra.gmra.mxu2 %v140_v5  ;;  %v372_v5 = vld [vmem:[#allocation2 + $0x378] sm:$0xff] }
 0x130   :  { %350 = vmatpush.msrb.mxu2 %v314_v4  ;;  %378 = vmatpush.msrb.mxu3 %v372_v5 }
 0x132   :  { %379 = vmatpush.msrb.mxu3 %v371_v6 }
 0x134   :  { %380 = vmatpush.msrb.mxu3 %v370_v7 }
 0x136   :  { %381 = vmatpush.msrb.mxu3 %v369_v8 }
 0x138   :  { %382 = vmatpush.msrb.mxu3 %v368_v9 }
 0x13a   :  { %383 = vmatpush.msrb.mxu3 %v367_v10 }
 0x13c   :  { %384 = vmatpush.msrb.mxu3 %v366_v11 }
 0x13e   :  { %385 = vmatpush.msrb.mxu3 %v365_v12 }
 0x140   :  { %386 = vmatpush.msrb.mxu3 %v364_v13 }
 0x142   :  { %387 = vmatpush.msrb.mxu3 %v363_v14 }
 0x144   :  { %388 = vmatpush.msrb.mxu3 %v362_v15 }
 0x146   :  { %389 = vmatpush.msrb.mxu3 %v361_v16 }
 0x148   :  { %390 = vmatpush.msrb.mxu3 %v360_v17 }
 0x1b2   :  { %v180_v23 = vpop.f32.mrf.mxu2 }
 0x1b3   :  { %v181_v24 = vadd.f32 %v458_v22, %v180_v23  ;;  %v359_v22 = vld [vmem:[#allocation2 + $0x310] sm:$0xff]  ;;  %v358_v23 = vld [vmem:[#allocation2 + $0x308] sm:$0xff] }
 0x1b4   :  { %391 = vmatpush.msrb.mxu3 %v359_v22 }
 0x1b5   :  { %v183_v25 = vmax.f32 %v181_v24, 0.0  ;;  %v357_v24 = vld [vmem:[#allocation2 + $0x300] sm:$0xff] }
 0x1b6   :  { %392 = vmatpush.msrb.mxu3 %v358_v23 }
 0x1b7   :  { %222 = vmatmul.f32.vlgmr.msra.gmra.mxu3 %v183_v25  ;;  %v414_v25 = vld [vmem:[#allocation4 + $0x78] sm:$0xff] }
 0x1b8   :  { %393 = vmatpush.msrb.mxu3 %v357_v24  ;;  %419 = vmatpush.msra.mxu0 %v414_v25 }
 0x1ba   :  { %420 = vmatpush.msra.mxu0 %v413_v26 }
 0x1bc   :  { %421 = vmatpush.msra.mxu0 %v412_v27 }
 0x1be   :  { %422 = vmatpush.msra.mxu0 %v411_v28 }
 0x1c0   :  { %423 = vmatpush.msra.mxu0 %v410_v29 }
 0x1c2   :  { %424 = vmatpush.msra.mxu0 %v409_v30 }
 0x1c4   :  { %425 = vmatpush.msra.mxu0 %v408_v31 }
 0x1c6   :  { %426 = vmatpush.msra.mxu0 %v407_v32 }
 0x1c8   :  { %427 = vmatpush.msra.mxu0 %v406_v33 }
 0x1ca   :  { %428 = vmatpush.msra.mxu0 %v405_v34 }
 0x1cc   :  { %429 = vmatpush.msra.mxu0 %v404_v35 }
 0x1ce   :  { %430 = vmatpush.msra.mxu0 %v403_v36 }
 0x1d0   :  { %431 = vmatpush.msra.mxu0 %v402_v37 }
 0x23a   :  { %v223_v43 = vpop.f32.mrf.mxu3 }
 0x23b   :  { %v224_v44 = vadd.f32 %v459_v42, %v223_v43  ;;  %v401_v42 = vld [vmem:[#allocation4 + $0x10] sm:$0xff]  ;;  %v400_v43 = vld [vmem:[#allocation4 + $0x8] sm:$0xff] }
 0x23c   :  { %432 = vmatpush.msra.mxu0 %v401_v42 }
 0x23d   :  { %v226_v45 = vmax.f32 %v224_v44, 0.0  ;;  %v399_v44 = vld [vmem:[#allocation4] sm:$0xff] }
 0x23e   :  { %433 = vmatpush.msra.mxu0 %v400_v43 }
 0x23f   :  { %265 = vmatmul.f32.vlgmr.msrb.gmra.mxu0 %v226_v45  ;;  %v463_v45 = vld [vmem:[%s652_s4 + $0x6] ss:$0 sm:$0xff] }
 0x240   :  { %434 = vmatpush.msra.mxu0 %v399_v44 }
 0x2bc   :  { %v266_v63 = vpop.f32.mrf.mxu0 }
 0x2bd   :  { %v267_v0 = vadd.f32 %v460_v62, %v266_v63 }
 0x2bf   :  { %v269_v1 = vmax.f32 %v267_v0, 0.0 }
 0x2c1   :  { %308 = vmatmul.f32.vlgmr.msrb.gmra.mxu1 %v269_v1 }
 0x33e   :  { %v309_v19 = vpop.f32.mrf.mxu1 }
 0x33f   :  { %v310_v20 = vadd.f32 %v461_v18, %v309_v19 }
 0x341   :  { %v312_v21 = vmax.f32 %v310_v20, 0.0 }
 0x343   :  { %351 = vmatmul.f32.vlgmr.msrb.gmra.mxu2 %v312_v21 }
 0x3c6   :  { %v352_v39 = vpop.f32.mrf.mxu2 }
 0x3c7   :  { %v353_v40 = vadd.f32 %v462_v38, %v352_v39 }
 0x3c9   :  { %v355_v41 = vmax.f32 %v353_v40, 0.0 }
 0x3cb   :  { %394 = vmatmul.f32.vlgmr.msrb.gmra.mxu3 %v355_v41 }
 0x44e   :  { %v395_v46 = vpop.f32.mrf.mxu3 }
 0x44f   :  { %v396_v47 = vadd.f32 %v463_v45, %v395_v46 }
 0x451   :  { %v398_v48 = vmax.f32 %v396_v47, 0.0 }
 0x453   :  { %435 = vmatmul.f32.vlgmr.msra.gmra.mxu0 %v398_v48 }
 0x4d0   :  { %v436_v50 = vpop.f32.mrf.mxu0 }
 0x4d1   :  { %v437_v51 = vadd.f32 %v464_v49, %v436_v50 }
 0x4d3   :  { %439 = vst [vmem:[%s655_s7] sm:$0xff] %v437_v51 }
 0x4d4   :  { %444 = vsyncpa [#allocation3], 1 }
 0x4d5   :  { %445 = vsyncpa [#allocation5], 1 }

</bundles_post_ra>
